<compile_context>
chip_gen: v7x
topology: tpu7x:2x2x1
jax: 0.10.0
libtpu: 0.0.40
codegen_flags: <defaults>
</compile_context>

<pallas_src>
import functools

import jax
import jax.numpy as jnp
from jax.experimental import pallas as pl
from jax.experimental.pallas import tpu as pltpu

_EPS = 1e-7


def _temporal_decoder_kernel(x_ref, w1_ref, b1_ref, w2_ref, b2_ref,
                             base_ref, u_ref, o_ref, *, max_delta):
    # x_ref: (B, F)  w1_ref: (F, H)  b1_ref: (1, H)
    # w2_ref: (H, 1) b2_ref: (1, 1)  base_ref: (1, 1)  u_ref: (B, 1)  o_ref: (B, 1)

    # Linear(F -> H) + SiLU
    x = x_ref[...]
    h = jnp.dot(x, w1_ref[...], preferred_element_type=jnp.float32) + b1_ref[...]
    h = h * (1.0 / (1.0 + jnp.exp(-h)))                       # SiLU (EUP exp is cheap)

    # Linear(H -> 1) + Softplus (numerically stable form: only exp/log/abs/max)
    z = jnp.dot(h, w2_ref[...], preferred_element_type=jnp.float32) + b2_ref[...]
    softplus_z = jnp.maximum(z, 0.0) + jnp.log(1.0 + jnp.exp(-jnp.abs(z)))

    intensity = softplus_z + base_ref[...]                    # (1,1) broadcasts to (B,1)
    intensity = jnp.maximum(intensity, _EPS)

    # Exponential inverse-CDF sample from the supplied uniform draw.
    u = u_ref[...] * (1.0 - 2.0 * _EPS) + _EPS
    delta = -jnp.log(u) / intensity

    o_ref[...] = jnp.clip(delta, _EPS, max_delta).astype(o_ref.dtype)


def temporal_decoder(e_tau, params, u, *, max_delta=300.0):
    """e_tau: (b_s, 1, feature_dim); params from init_params; u: (b_s, 1) uniform [0,1)."""
    w1, b1, w2, b2, base_rate = params
    b_s = e_tau.shape[0]
    f = e_tau.shape[-1]

    # Metadata-only reshapes (no HBM transposes).
    x2d = e_tau.reshape(b_s, f)                    # squeeze(1)
    b1_2d = b1.reshape(1, -1)
    b2_2d = b2.reshape(1, 1)
    base_2d = base_rate.reshape(1, 1)
    u2d = u.reshape(b_s, 1)

    out = pl.pallas_call(
        functools.partial(_temporal_decoder_kernel, max_delta=max_delta),
        out_shape=jax.ShapeDtypeStruct((b_s, 1), jnp.float32),
        in_specs=[pl.BlockSpec(memory_space=pltpu.MemorySpace.VMEM)
                  for _ in range(7)],
        out_specs=pl.BlockSpec(memory_space=pltpu.MemorySpace.VMEM),
    )(x2d, w1, b1_2d, w2, b2_2d, base_2d, u2d)

    return out.reshape(b_s)                        # .squeeze()


def init_params(key, feature_dim, hidden, dtype=jnp.float32):
    """Mimics the PyTorch init: default Linear init for layer 1,
    xavier_normal_(gain=0.1) + bias=0.5 for the final 64->1 layer."""
    k1, k2, k3 = jax.random.split(key, 3)
    bound1 = 1.0 / jnp.sqrt(jnp.asarray(feature_dim, jnp.float32))
    # Stored already transposed (in_dim, out_dim) so the kernel does x @ W.
    w1 = jax.random.uniform(k1, (feature_dim, hidden), dtype, -bound1, bound1)
    b1 = jax.random.uniform(k2, (hidden,), dtype, -bound1, bound1)
    std2 = 0.1 * jnp.sqrt(2.0 / (hidden + 1.0))
    w2 = (std2 * jax.random.normal(k3, (hidden, 1))).astype(dtype)
    b2 = jnp.full((1,), 0.5, dtype)
    base_rate = jnp.asarray(0.1, dtype)
    return w1, b1, w2, b2, base_rate


def reference(e_tau, params, u, *, max_delta=300.0):
    """Pure-JAX reference of the PyTorch forward (same uniform draw u)."""
    w1, b1, w2, b2, base_rate = params
    b_s = e_tau.shape[0]
    x = e_tau.reshape(b_s, e_tau.shape[-1])
    h = jax.nn.silu(x @ w1 + b1[None, :])
    z = h @ w2 + b2[None, :]
    intensity = jax.nn.softplus(z) + base_rate
    intensity = jnp.maximum(intensity, _EPS)
    uu = u * (1.0 - 2.0 * _EPS) + _EPS
    delta = -jnp.log(uu) / intensity
    return jnp.clip(delta.reshape(b_s), _EPS, max_delta)


if __name__ == "__main__":
    feature_dim = 32
    hidden = 64
    b_s = 8
    max_delta = 300.0

    key = jax.random.PRNGKey(0)
    kx, kp, ku = jax.random.split(key, 3)
    e_tau = jax.random.normal(kx, (b_s, 1, feature_dim), dtype=jnp.float32)
    params = init_params(kp, feature_dim, hidden)
    # Uniform noise for the point-process sample (torch.rand_like equivalent),
    # drawn in the wrapper so the kernel stays deterministic and verifiable.
    u = jax.random.uniform(ku, (b_s, 1), dtype=jnp.float32)

    out = temporal_decoder(e_tau, params, u, max_delta=max_delta)
    out = jax.block_until_ready(out)

    ref = reference(e_tau, params, u, max_delta=max_delta)
    assert out.shape == (b_s,)
    assert jnp.allclose(out, ref, atol=1e-4, rtol=1e-4), "mismatch vs reference"

    print("KERNEL_OK")
</pallas_src>

<mosaic_0001>
module attributes {stable_mosaic.version = 11 : i64} {
  func.func @_temporal_decoder_kernel(%arg0: memref<8x32xf32, #tpu.memory_space<vmem>>, %arg1: memref<32x64xf32, #tpu.memory_space<vmem>>, %arg2: memref<1x64xf32, #tpu.memory_space<vmem>>, %arg3: memref<64x1xf32, #tpu.memory_space<vmem>>, %arg4: memref<1x1xf32, #tpu.memory_space<vmem>>, %arg5: memref<1x1xf32, #tpu.memory_space<vmem>>, %arg6: memref<8x1xf32, #tpu.memory_space<vmem>>, %arg7: memref<8x1xf32, #tpu.memory_space<vmem>>) attributes {dimension_semantics = [], scalar_prefetch = 0 : i64, scratch_operands = 0 : i64, tpu.core_type = #tpu.core_type<tc>} {
    %c0 = arith.constant 0 : index
    %c0_0 = arith.constant 0 : index
    %0 = vector.load %arg0[%c0, %c0_0] : memref<8x32xf32, #tpu.memory_space<vmem>>, vector<8x32xf32>
    %c0_1 = arith.constant 0 : index
    %c0_2 = arith.constant 0 : index
    %1 = vector.load %arg1[%c0_1, %c0_2] : memref<32x64xf32, #tpu.memory_space<vmem>>, vector<32x64xf32>
    %cst = arith.constant dense<0.000000e+00> : vector<8x64xf32>
    %2 = tpu.matmul %0, %1, %cst {dimension_numbers = #tpu.dot_dimension_numbers<[1], [0], [0], [1], [0, 0, 1, 1], [], []>} : vector<8x32xf32>, vector<32x64xf32>, vector<8x64xf32> -> vector<8x64xf32>
    %c0_3 = arith.constant 0 : index
    %c0_4 = arith.constant 0 : index
    %3 = vector.load %arg2[%c0_3, %c0_4] : memref<1x64xf32, #tpu.memory_space<vmem>>, vector<1x64xf32>
    %4 = vector.broadcast %3 : vector<1x64xf32> to vector<8x64xf32>
    %5 = arith.addf %2, %4 : vector<8x64xf32>
    %cst_5 = arith.constant 0.000000e+00 : f32
    %6 = vector.broadcast %cst_5 : f32 to vector<8x64xf32>
    %7 = arith.subf %6, %5 : vector<8x64xf32>
    %8 = math.exp %7 : vector<8x64xf32>
    %cst_6 = arith.constant 1.000000e+00 : f32
    %9 = vector.broadcast %cst_6 : f32 to vector<8x64xf32>
    %10 = arith.addf %9, %8 : vector<8x64xf32>
    %cst_7 = arith.constant 1.000000e+00 : f32
    %11 = vector.broadcast %cst_7 : f32 to vector<8x64xf32>
    %12 = arith.divf %11, %10 : vector<8x64xf32>
    %13 = arith.mulf %5, %12 : vector<8x64xf32>
    %c0_8 = arith.constant 0 : index
    %c0_9 = arith.constant 0 : index
    %14 = vector.load %arg3[%c0_8, %c0_9] : memref<64x1xf32, #tpu.memory_space<vmem>>, vector<64x1xf32>
    %cst_10 = arith.constant dense<0.000000e+00> : vector<8x1xf32>
    %15 = tpu.matmul %13, %14, %cst_10 {dimension_numbers = #tpu.dot_dimension_numbers<[1], [0], [0], [1], [0, 0, 1, 1], [], []>} : vector<8x64xf32>, vector<64x1xf32>, vector<8x1xf32> -> vector<8x1xf32>
    %c0_11 = arith.constant 0 : index
    %c0_12 = arith.constant 0 : index
    %16 = vector.load %arg4[%c0_11, %c0_12] : memref<1x1xf32, #tpu.memory_space<vmem>>, vector<1x1xf32>
    %17 = vector.broadcast %16 : vector<1x1xf32> to vector<8x1xf32>
    %18 = arith.addf %15, %17 : vector<8x1xf32>
    %cst_13 = arith.constant 0.000000e+00 : f32
    %19 = vector.broadcast %cst_13 : f32 to vector<8x1xf32>
    %20 = arith.maximumf %18, %19 : vector<8x1xf32>
    %21 = math.absf %18 : vector<8x1xf32>
    %cst_14 = arith.constant 0.000000e+00 : f32
    %22 = vector.broadcast %cst_14 : f32 to vector<8x1xf32>
    %23 = arith.subf %22, %21 : vector<8x1xf32>
    %24 = math.exp %23 : vector<8x1xf32>
    %cst_15 = arith.constant 1.000000e+00 : f32
    %25 = vector.broadcast %cst_15 : f32 to vector<8x1xf32>
    %26 = arith.addf %25, %24 : vector<8x1xf32>
    %27 = math.log %26 : vector<8x1xf32>
    %28 = arith.addf %20, %27 : vector<8x1xf32>
    %c0_16 = arith.constant 0 : index
    %c0_17 = arith.constant 0 : index
    %29 = vector.load %arg5[%c0_16, %c0_17] : memref<1x1xf32, #tpu.memory_space<vmem>>, vector<1x1xf32>
    %30 = vector.broadcast %29 : vector<1x1xf32> to vector<8x1xf32>
    %31 = arith.addf %28, %30 : vector<8x1xf32>
    %cst_18 = arith.constant 1.000000e-07 : f32
    %32 = vector.broadcast %cst_18 : f32 to vector<8x1xf32>
    %33 = arith.maximumf %31, %32 : vector<8x1xf32>
    %c0_19 = arith.constant 0 : index
    %c0_20 = arith.constant 0 : index
    %34 = vector.load %arg6[%c0_19, %c0_20] : memref<8x1xf32, #tpu.memory_space<vmem>>, vector<8x1xf32>
    %cst_21 = arith.constant 0.999999821 : f32
    %35 = vector.broadcast %cst_21 : f32 to vector<8x1xf32>
    %36 = arith.mulf %34, %35 : vector<8x1xf32>
    %cst_22 = arith.constant 1.000000e-07 : f32
    %37 = vector.broadcast %cst_22 : f32 to vector<8x1xf32>
    %38 = arith.addf %36, %37 : vector<8x1xf32>
    %39 = math.log %38 : vector<8x1xf32>
    %cst_23 = arith.constant 0.000000e+00 : f32
    %40 = vector.broadcast %cst_23 : f32 to vector<8x1xf32>
    %41 = arith.subf %40, %39 : vector<8x1xf32>
    %42 = arith.divf %41, %33 : vector<8x1xf32>
    %cst_24 = arith.constant 1.000000e-07 : f32
    %cst_25 = arith.constant 3.000000e+02 : f32
    %43 = vector.broadcast %cst_24 : f32 to vector<8x1xf32>
    %44 = arith.maximumf %43, %42 : vector<8x1xf32>
    %45 = vector.broadcast %cst_25 : f32 to vector<8x1xf32>
    %46 = arith.minimumf %45, %44 : vector<8x1xf32>
    %c0_26 = arith.constant 0 : index
    %c0_27 = arith.constant 0 : index
    %47 = vector.load %arg7[%c0_26, %c0_27] : memref<8x1xf32, #tpu.memory_space<vmem>>, vector<8x1xf32>
    tpu.vector_store %arg7[%c0_26, %c0_27], %46 {strides = array<i32>} : memref<8x1xf32, #tpu.memory_space<vmem>>, vector<8x1xf32>,
    return
  }
}

</mosaic_0001>

<bundles_post_ra>
// kernel: tpu_custom_call.1
= control target key start
LH: loop header
LB: loop body
LE: loop exit
PB: predicated region body
PF: predicated region fallthrough
CT: control target
= control target key end

     0   :  { %v328_v0 = vmov 0.0|0.0   ;;  %vm329_vm0 = vmmov 0   ;;  %v330_v4 = vmov 0.0   ;;  %vm42_vm1 = vcmask 261120   ;;  %s425_s1 = inlined_call_operand.vmem [shape: f32[32,64], index: 1, kind: input, shape index: {}]   ;;  %s426_s0 = inlined_call_operand.vmem [shape: f32[8,32], index: 0, kind: input, shape index: {}]   ;;  %s427_s3 = inlined_call_operand.vmem [shape: f32[64,1], index: 3, kind: input, shape index: {}]   ;;  %s428_s4 = inlined_call_operand.<no memory space> [shape: f32[1,1], index: 4, kind: input, shape index: {}]   ;;  %s429_s5 = inlined_call_operand.<no memory space> [shape: f32[1,1], index: 5, kind: input, shape index: {}]   ;;  %s430_s2 = inlined_call_operand.vmem [shape: f32[1,64], index: 2, kind: input, shape index: {}]   ;;  %s431_s6 = inlined_call_operand.vmem [shape: f32[8,1], index: 6, kind: input, shape index: {}]   ;;  %s432_s7 = inlined_call_operand.vmem [shape: f32[8,1], index: 7, kind: output, shape index: {}]  }
   0x1   :  { %295 = vmatprep.subr.bf16.mxu0 %v328_v0  ;;  %v31_v1 = vld [vmem:[%s425_s1] sm:$0xff]  ;;  %v32_v2 = vld [vmem:[%s425_s1 + $0x8] sm:$0xff]  ;;  %v33_v3 = vld [vmem:[%s425_s1 + $0x10] sm:$0xff]  ;;  %273 = vmatprep.mubr.msk.f32.mxu0 %vm329_vm0, %v330_v4  ;;  %v12_v21 = vstv %s428_s4  ;;  %vm138_vm2 = vcmask 523264   ;;  %vm240_vm3 = vcmask 7168  }
   0x2   :  { %v296_v5 = vpack.c.bf16 %v32_v2, %v31_v1  ;;  %v34_v6 = vld [vmem:[%s425_s1 + $0x18] sm:$0xff]  ;;  %301 = vmatprep.subr.bf16.mxu1 %v328_v0  ;;  %292 = vmatprep.mubr.msk.f32.mxu1 %vm329_vm0, %v330_v4  ;;  %v30_v8 = vld [vmem:[%s426_s0] sm:$0xff]  ;;  %v124_v10 = vld [vmem:[%s427_s3 + $0x8] sm:$0xff]  ;;  %v14_v22 = vstv %s429_s5  ;;  %13 = vst [vmem:[#allocation2] sm:$0x1] %v12_v21 }
   0x3   :  { %v299_v7 = vpack.c.bf16 %v34_v6, %v33_v3  ;;  %v123_v9 = vld [vmem:[%s427_s3] sm:$0xff]  ;;  %v125_v12 = vld [vmem:[%s427_s3 + $0x10] sm:$0xff]  ;;  %v126_v13 = vld [vmem:[%s427_s3 + $0x18] sm:$0xff]  ;;  %15 = vst [vmem:[#allocation3] sm:$0x1] %v14_v22 }
   0x4   :  { %297 = vmatpush3.bf16.msra.mxu0 %v296_v5  ;;  %v302_v11 = vpack.c.bf16 %v124_v10, %v123_v9  ;;  %v305_v14 = vpack.c.bf16 %v126_v13, %v125_v12  ;;  %v127_v15 = vld [vmem:[%s427_s3 + $0x20] sm:$0xff]  ;;  %v128_v16 = vld [vmem:[%s427_s3 + $0x28] sm:$0xff]  ;;  %v129_v18 = vld [vmem:[%s427_s3 + $0x30] sm:$0xff] }
   0x5   :  { %298 = vmatprep.subr.bf16.mxu0 %v328_v0  ;;  %v308_v17 = vpack.c.bf16 %v128_v16, %v127_v15  ;;  %v130_v19 = vld [vmem:[%s427_s3 + $0x38] sm:$0xff]  ;;  %v246_v23 = vld [vmem:[%s430_s2] ss:$0 sm:$0xff] }
   0x6   :  { %303 = vmatpush3.bf16.msra.mxu1 %v302_v11  ;;  %v311_v20 = vpack.c.bf16 %v130_v19, %v129_v18  ;;  %v230_v42 = vld [vmem:[%s431_s6] sm:$0xff] }
   0x7   :  { %304 = vmatprep.subr.bf16.mxu1 %v328_v0  ;;  %v231_v43 = vmul.f32 0.9999998, %v230_v42 }
   0x8   :  { %300 = vmatpush3.bf16.msra.mxu0 %v299_v7 }
   0x9   :  { %v248_v33 = vld [vmem:[#allocation2] ss:$0 sm:$0xff]  ;;  %v232_v44 = vadd.f32 1e-07, %v231_v43 }
   0xa   :  { %306 = vmatpush3.bf16.msra.mxu1 %v305_v14  ;;  %v250_v48 = vld [vmem:[#allocation3] ss:$0 sm:$0xff] }
   0xb   :  { %274 = vmatmul.mubr.msk.f32.vlgmr.msra.gmra.mrb[0].mxu0 %vm42_vm1, %v30_v8  ;;  %307 = vmatprep.subr.bf16.mxu1 %v328_v0 }
   0xe   :  { %309 = vmatpush3.bf16.msra.mxu1 %v308_v17 }
   0xf   :  { %310 = vmatprep.subr.bf16.mxu1 %v328_v0 }
  0x12   :  { %312 = vmatpush3.bf16.msra.mxu1 %v311_v20 }
  0xde   :  { %v112_v24 = vpop.f32.mrb[0].mxu0 }
  0xdf   :  { %v113_v25 = vadd.f32 %v246_v23, %v112_v24  ;;  %v275_v26 = vpop.f32.mrb[1].mxu0 }
  0xe1   :  { %v116_v27 = vsub.f32 0.0, %v113_v25 }
  0xe3   :  { %v117_v28 = vmul.f32 1.442695, %v116_v27 }
  0xe5   :  { %316 = vpow2.f32 %v117_v28 }
  0xef   :  { %v317_v29 = vpop.eup %316 }
  0xf0   :  { %v119_v30 = vadd.f32 1.0, %v317_v29 }
  0xf2   :  { %318 = vrcp.f32 %v119_v30 }
  0xfc   :  { %v319_v31 = vpop.eup %318 }
  0xfd   :  { %v122_v32 = vmul.f32 %v319_v31, %v113_v25 }
  0xff   :  { %293 = vmatmul.mubr.msk.f32.vlgmr.msra.gmra.mrb[0].mxu1 %vm138_vm2, %v122_v32 }
 0x1d2   :  { %v208_v34 = vpop.f32.mrb[0].mxu1 }
 0x1d3   :  { %v209_v35 = vadd.f32 %v248_v33, %v208_v34  ;;  %v294_v36 = vpop.f32.mrb[1].mxu1 }
 0x1d5   :  { %v213_v37 = vand.u32 2147483647, %v209_v35  ;;  %v212_v46 = vmax.f32 %v209_v35, 0.0 }
 0x1d7   :  { %v214_v38 = vsub.f32 0.0, %v213_v37 }
 0x1d9   :  { %v215_v39 = vmul.f32 1.442695, %v214_v38 }
 0x1db   :  { %320 = vpow2.f32 %v215_v39 }
 0x1e5   :  { %v321_v40 = vpop.eup %320 }
 0x1e6   :  { %v217_v41 = vadd.f32 1.0, %v321_v40 }
 0x1e8   :  { %322 = vlog2.f32 %v217_v41 }
 0x1e9   :  { %324 = vlog2.f32 %v232_v44 }
 0x1f2   :  { %v323_v45 = vpop.eup %322 }
 0x1f3   :  { %v219_v47 = vmul.f32 0.6931472, %v323_v45  ;;  %v325_v52 = vpop.eup %324 }
 0x1f4   :  { %v234_v53 = vmul.f32 0.6931472, %v325_v52 }
 0x1f5   :  { %v220_v49 = vadd.f32 %v219_v47, %v212_v46 }
 0x1f6   :  { %v235_v54 = vsub.f32 0.0, %v234_v53 }
 0x1f7   :  { %v228_v50 = vadd.f32 %v250_v48, %v220_v49 }
 0x1f9   :  { %v229_v51 = vmax.f32 %v228_v50, 1e-07 }
 0x1fb   :  { %326 = vrcp.f32 %v229_v51 }
 0x205   :  { %v327_v55 = vpop.eup %326 }
 0x206   :  { %v237_v56 = vmul.f32 %v327_v55, %v235_v54 }
 0x208   :  { %v238_v57 = vmax.f32 %v237_v56, 1e-07 }
 0x20a   :  { %v239_v58 = vmin.f32 %v238_v57, 300.0 }
 0x20c   :  { %241 = vst.msk [vmem:[%s432_s7] sm:$0xff] %vm240_vm3, %v239_v58 }

</bundles_post_ra>
